<compile_context>
chip_gen: v6e
topology: v6e:2x2x1
jax: 0.10.0
libtpu: 0.0.40
codegen_flags: <defaults>
</compile_context>

<pallas_src>
import functools
import math

import jax
import jax.numpy as jnp
from jax.experimental import pallas as pl
from jax.experimental.pallas import tpu as pltpu


# ---------------------------------------------------------------------------
# Buffer construction — deterministic, mirrors the PyTorch init.
# ---------------------------------------------------------------------------
def make_pos_embedding(emb_size: int, maxlen: int) -> jnp.ndarray:
    den = jnp.exp(-jnp.arange(0, emb_size, 2, dtype=jnp.float32)
                  * math.log(10000.0) / emb_size)                      # (E/2,)
    pos = jnp.arange(0, maxlen, dtype=jnp.float32).reshape(maxlen, 1)  # (L, 1)
    ang = pos * den                                                    # (L, E/2)
    pe = jnp.zeros((maxlen, emb_size), dtype=jnp.float32)
    pe = pe.at[:, 0::2].set(jnp.sin(ang))
    pe = pe.at[:, 1::2].set(jnp.cos(ang))
    return pe[None, :, :]                                              # (1, L, E)


# ---------------------------------------------------------------------------
# Kernels (2-D lane-dense blocks: x/out (TILE_B, TILE_N), pos (1, TILE_N))
# ---------------------------------------------------------------------------
def _add_pe_kernel(x_ref, pos_ref, o_ref):
    # Broadcast-add over the (sublane) batch dim, all in the input dtype.
    o_ref[...] = x_ref[...] + pos_ref[...]


def _add_pe_dropout_kernel(x_ref, pos_ref, bits_ref, o_ref, *, threshold, scale):
    y = x_ref[...] + pos_ref[...]
    keep = bits_ref[...] >= jnp.uint32(threshold)          # P(keep) = 1 - p
    o_ref[...] = jnp.where(keep, y * jnp.asarray(scale, y.dtype),
                           jnp.zeros((), y.dtype))


# ---------------------------------------------------------------------------
# Tile-size heuristic: largest multiple of `align` that divides `dim`,
# capped at `max_tile`; falls back to the full dim (always a legal block).
# ---------------------------------------------------------------------------
def _pick_tile(dim: int, align: int, max_tile: int) -> int:
    if dim <= max_tile:
        return dim
    if dim % align != 0:
        return dim
    t = (max_tile // align) * align
    while t >= align:
        if dim % t == 0:
            return t
        t -= align
    return dim


# ---------------------------------------------------------------------------
# Wrapper
# ---------------------------------------------------------------------------
def positional_encoding_forward(x: jnp.ndarray,
                                pos_embedding: jnp.ndarray,
                                dropout_p: float,
                                *,
                                training: bool = False,
                                rng_key=None) -> jnp.ndarray:
    """x: (B, S, E); pos_embedding: (1, maxlen, E).  Returns (B, S, E)."""
    B, S, E = x.shape
    N = S * E
    p = float(dropout_p)
    assert 0.0 <= p < 1.0, "dropout probability must be in [0, 1)"

    # Lane-dense 2-D views; pos pre-cast to the compute dtype.
    x2 = x.reshape(B, N)
    pos2 = pos_embedding[:, :S, :].astype(x.dtype).reshape(1, N)

    itemsize = jnp.dtype(x.dtype).itemsize
    TILE_N = _pick_tile(N, 128, 4096)                                  # lane dim
    max_b = max(8, (2 * 1024 * 1024) // max(1, TILE_N * itemsize))     # ~2 MiB/block
    TILE_B = _pick_tile(B, 8, max_b)                                   # sublane dim
    grid = (N // TILE_N, B // TILE_B)   # batch innermost -> pos tile stays resident

    x_spec = pl.BlockSpec((TILE_B, TILE_N), lambda j, i: (i, j))
    pos_spec = pl.BlockSpec((1, TILE_N), lambda j, i: (0, j))
    out_spec = pl.BlockSpec((TILE_B, TILE_N), lambda j, i: (i, j))

    use_dropout = training and p > 0.0
    if use_dropout:
        if rng_key is None:
            rng_key = jax.random.PRNGKey(0)
        bits = jax.random.bits(rng_key, (B, N), dtype=jnp.uint32)
        threshold = min(int(round(p * (1 << 32))), (1 << 32) - 1)
        kernel = functools.partial(_add_pe_dropout_kernel,
                                   threshold=threshold,
                                   scale=1.0 / (1.0 - p))
        in_specs = [x_spec, pos_spec,
                    pl.BlockSpec((TILE_B, TILE_N), lambda j, i: (i, j))]
        operands = (x2, pos2, bits)
    else:
        kernel = _add_pe_kernel
        in_specs = [x_spec, pos_spec]
        operands = (x2, pos2)

    out2 = pl.pallas_call(
        kernel,
        out_shape=jax.ShapeDtypeStruct((B, N), x.dtype),
        grid_spec=pltpu.PrefetchScalarGridSpec(
            num_scalar_prefetch=0,
            grid=grid,
            in_specs=in_specs,
            out_specs=out_spec,
        ),
        compiler_params=pltpu.CompilerParams(
            dimension_semantics=("parallel", "parallel"),
        ),
    )(*operands)

    return out2.reshape(B, S, E)


# ---------------------------------------------------------------------------
# Pure-JAX reference (eval mode)
# ---------------------------------------------------------------------------
def _ref_eval(x, pos_embedding):
    S = x.shape[1]
    return x + pos_embedding[:, :S, :]


if __name__ == "__main__":
    batch, seq, emb, maxlen = 2, 8, 32, 64
    dropout_p = 0.1

    key = jax.random.PRNGKey(0)
    kx, kd = jax.random.split(key)
    x = jax.random.normal(kx, (batch, seq, emb), dtype=jnp.float32)
    pos_emb = make_pos_embedding(emb, maxlen)

    # Eval mode (dropout == identity): must match the reference.
    out_eval = positional_encoding_forward(x, pos_emb, dropout_p, training=False)
    out_eval = jax.block_until_ready(out_eval)
    ref = _ref_eval(x, pos_emb)
    assert out_eval.shape == (batch, seq, emb)
    assert jnp.allclose(out_eval, ref, atol=1e-6, rtol=1e-6)

    # Training mode: dropout applied inside the kernel.
    out_train = positional_encoding_forward(x, pos_emb, dropout_p,
                                            training=True, rng_key=kd)
    out_train = jax.block_until_ready(out_train)
    assert out_train.shape == (batch, seq, emb)
    # Every surviving element equals (x + pos) / (1 - p); dropped elements are 0.
    scaled = ref / (1.0 - dropout_p)
    ok = jnp.logical_or(jnp.isclose(out_train, 0.0, atol=1e-6),
                        jnp.isclose(out_train, scaled, atol=1e-5, rtol=1e-5))
    assert bool(jnp.all(ok))

    print("KERNEL_OK")
</pallas_src>

<mosaic_0001>
module attributes {stable_mosaic.version = 11 : i64} {
  func.func @_add_pe_kernel(%arg0: i32, %arg1: i32, %arg2: memref<2x256xf32, #tpu.memory_space<vmem>>, %arg3: memref<1x256xf32, #tpu.memory_space<vmem>>, %arg4: memref<2x256xf32, #tpu.memory_space<vmem>>) attributes {dimension_semantics = [#tpu.dimension_semantics<parallel>, #tpu.dimension_semantics<parallel>], iteration_bounds = array<i64: 1, 1>, scalar_prefetch = 0 : i64, scratch_operands = 0 : i64, tpu.core_type = #tpu.core_type<tc>, window_params = [{transform_indices = @transform_0, window_bounds = array<i64: 2, 256>}, {transform_indices = @transform_1, window_bounds = array<i64: 1, 256>}, {transform_indices = @transform_2, window_bounds = array<i64: 2, 256>}]} {
    %c0 = arith.constant 0 : index
    %c0_0 = arith.constant 0 : index
    %0 = vector.load %arg2[%c0, %c0_0] : memref<2x256xf32, #tpu.memory_space<vmem>>, vector<2x256xf32>
    %c0_1 = arith.constant 0 : index
    %c0_2 = arith.constant 0 : index
    %1 = vector.load %arg3[%c0_1, %c0_2] : memref<1x256xf32, #tpu.memory_space<vmem>>, vector<1x256xf32>
    %2 = vector.broadcast %1 : vector<1x256xf32> to vector<2x256xf32>
    %3 = arith.addf %0, %2 : vector<2x256xf32>
    %c0_3 = arith.constant 0 : index
    %c0_4 = arith.constant 0 : index
    %4 = vector.load %arg4[%c0_3, %c0_4] : memref<2x256xf32, #tpu.memory_space<vmem>>, vector<2x256xf32>
    tpu.vector_store %arg4[%c0_3, %c0_4], %3 {strides = array<i32>} : memref<2x256xf32, #tpu.memory_space<vmem>>, vector<2x256xf32>,
    return
  }
  func.func @transform_0(%arg0: i32, %arg1: i32) -> (i32, i32) {
    %c0_i32 = arith.constant 0 : i32
    return %arg1, %arg0 : i32, i32
  }
  func.func @transform_1(%arg0: i32, %arg1: i32) -> (i32, i32) {
    %c0_i32 = arith.constant 0 : i32
    %c0_i32_0 = arith.constant 0 : i32
    return %c0_i32, %arg0 : i32, i32
  }
  func.func @transform_2(%arg0: i32, %arg1: i32) -> (i32, i32) {
    %c0_i32 = arith.constant 0 : i32
    return %arg1, %arg0 : i32, i32
  }
}

</mosaic_0001>

<bundles_post_ra>
// kernel: tpu_custom_call.1
= control target key start
LH: loop header
LB: loop body
LE: loop exit
PB: predicated region body
PF: predicated region fallthrough
CT: control target
= control target key end

     0   :  { %7 = vsyncpa [#allocation3], 0  ;;  %s172_s0 = inlined_call_operand.hbm [shape: f32[2,256], index: 0, kind: input, shape index: {}]   ;;  %s173_s1 = inlined_call_operand.hbm [shape: f32[1,256], index: 1, kind: input, shape index: {}]   ;;  %s174_s2 = inlined_call_operand.hbm [shape: f32[2,256], index: 2, kind: output, shape index: {}]  }
   0x1   :  { %8 = vsyncpa [#allocation6], 0 }
   0x2   :  { %9 = vsyncpa [#allocation4], 0  ;;  %s144_s9 = smov [#allocation2]   ;;  %s145_s11 = smov [#allocation5]  }
   0x3   :  { %s16_s10 = sshll.u32 %s144_s9, 4  ;;  %s26_s12 = sshll.u32 %s145_s11, 4  ;;  %s17_s10 = int_to_ptr.vmem [resolvable:$true] %s16_s10  ;;  %s27_s12 = int_to_ptr.vmem [resolvable:$true] %s26_s12 }
   0x4   :  { %s86_s13 = scalar_lea.vmem %s17_s10, 64  ;;  %p91_p1 = scmp.lt.s32.totalorder %s17_s10, %s17_s10 }
   0x5   :  { %p87_p0 = scmp.ne.s32.totalorder %s17_s10, %s86_s13  ;;  %p92_p2 = scmp.lt.s32.totalorder %s86_s13, %s86_s13 }
   0x7   :  { %p93_p3 = por %p92_p2, %p91_p1 }
   0x9   :  { %p94_p4 = pnand %p93_p3, %p87_p0 }
   0xb   :  { %97 = shalt.err (!%p94_p4)
}
   0xc   :  { %19 = dma.hbm_to_vmem [thread:$0]  %s172_s0, 64, %s17_s10, [#allocation3]  }
   0xd   :  { %s106_s16 = scalar_lea.vmem %s27_s12, 32  ;;  %p111_p6 = scmp.lt.s32.totalorder %s27_s12, %s27_s12 }
   0xe   :  { %p107_p5 = scmp.ne.s32.totalorder %s27_s12, %s106_s16  ;;  %p112_p7 = scmp.lt.s32.totalorder %s106_s16, %s106_s16 }
  0x10   :  { %p113_p8 = por %p112_p7, %p111_p6 }
  0x12   :  { %p114_p9 = pnand %p113_p8, %p107_p5 }
  0x14   :  { %117 = shalt.err (!%p114_p9)
}
  0x15   :  { %29 = dma.hbm_to_vmem [thread:$0]  %s173_s1, 32, %s27_s12, [#allocation6]  }
  0x16   :  { %138 = dma.done.wait [#allocation3], 64  }
  0x17   :  { %139 = vsyncadd [#allocation3], 4294967232 }
  0x18   :  { %140 = dma.done.wait [#allocation6], 32  }
  0x19   :  { %141 = vsyncadd [#allocation6], 4294967264  ;;  %v39_v0 = vlaneseq  ;;  %v146_v1 = vmov 1983009808   ;;  %v37_v7 = vld [vmem:[#allocation5] sm:$0x3] }
  0x1a   :  { %v49_v2 = vunpack.c.l.s4 %v146_v1  ;;  %v36_v12 = vld [vmem:[#allocation2] sm:$0xf]  ;;  %s147_s0 = smov [#allocation7]  }
  0x1b   :  { %v40_v3 = vshrl.u32 %v39_v0, 7  ;;  %s64_s19 = sshll.u32 %s147_s0, 4  ;;  %s65_s19 = int_to_ptr.vmem [resolvable:$true] %s64_s19 }
  0x1c   :  { %v50_v6 = vunpack.c.0.s8 %v49_v2  ;;  %s118_s1 = scalar_lea.vmem %s65_s19, 64  ;;  %p123_p11 = scmp.lt.s32.totalorder %s65_s19, %s65_s19 }
  0x1d   :  { %v41_v4 = vsub.s32 0, %v40_v3  ;;  %v45_v5 = vsub.s32 1, %v40_v3  ;;  %p119_p10 = scmp.ne.s32.totalorder %s65_s19, %s118_s1  ;;  %p124_p12 = scmp.lt.s32.totalorder %s118_s1, %s118_s1 }
  0x1e   :  { %v53_v10 = vsub.s32 %v50_v6, %v40_v3 }
  0x1f   :  { %v42_v8 = vrot.slane %v37_v7, %v41_v4  ;;  %v46_v9 = vrot.slane %v37_v7, %v45_v5  ;;  %p125_p13 = por %p124_p12, %p123_p11 }
  0x21   :  { %v47_v11 = vcombine.low %v42_v8, %v46_v9  ;;  %p126_p0 = pnand %p125_p13, %p119_p10 }
  0x23   :  { %v54_v13 = vrot.slane %v47_v11, %v53_v10 }
  0x25   :  { %v56_v14 = vadd.f32 %v54_v13, %v36_v12 }
  0x27   :  { %57 = vst [vmem:[#allocation7] sm:$0xf] %v56_v14 }
  0x28   :  { %129 = shalt.err (!%p126_p0)
}
  0x29   :  { %67 = dma.vmem_to_hbm [thread:$0]  %s65_s19, 64, %s174_s2, [#allocation4]  }
  0x2a   :  { %142 = dma.done.wait [#allocation4], 64  }
  0x2b   :  { %143 = vsyncadd [#allocation4], 4294967232 }
  0x2c   :  { %71 = vsyncpa [#allocation3], 1 }
  0x2d   :  { %72 = vsyncpa [#allocation6], 1 }
  0x2e   :  { %73 = vsyncpa [#allocation4], 1 }

</bundles_post_ra>
